<compile_context>
chip_gen: v5e
topology: v5e:2x2
jax: 0.10.0
libtpu: 0.0.40
codegen_flags: <defaults>
</compile_context>

<pallas_src>
import jax
import jax.numpy as jnp
from jax.experimental import pallas as pl
from jax.experimental.pallas import tpu as pltpu


def _round_up(x, m):
    return (x + m - 1) // m * m


def _vmem_tile_bytes(rows, cols, itemsize):
    # (sublane, lane)-padded VMEM footprint.  Sub-32-bit dtypes pack more rows
    # per sublane (bf16 -> 16, int8 -> 32), hence the scaled row rounding.
    sub = 8 * max(1, 4 // max(1, itemsize))
    return _round_up(max(rows, 1), sub) * _round_up(max(cols, 1), 128) * itemsize


def _onehot_kernel(ids_ref, table_ref, out_ref):
    """Small/medium vocab: one-hot @ table gather on the MXU.

    ids_ref:   (tile, 1) int32
    table_ref: (num_class, d_pad) resident block (constant index map)
    out_ref:   (tile, d_pad)   -- d_pad is a multiple of 128 (lane-dense)

    The padding_class row of the table was zeroed in the wrapper, so the plain
    one-hot gather already returns zero vectors for padding tokens -- no
    per-step mask pass is needed.
    """
    tile = ids_ref.shape[0]
    num_class = table_ref.shape[0]
    classes = jax.lax.broadcasted_iota(jnp.int32, (tile, num_class), 1)
    onehot = (ids_ref[...] == classes).astype(table_ref.dtype)
    out_ref[...] = jnp.dot(
        onehot, table_ref[...], preferred_element_type=jnp.float32
    ).astype(out_ref.dtype)


def _gather_kernel(ids_ref, table_ref, out_ref):
    """Large vocab: dynamic row gather from the resident VMEM table.

    Avoids the O(tile*num_class) one-hot build and 2*tile*num_class*D MXU
    FLOPs that make the one-hot path compute-bound for large num_class.
    (Not exercised by the small demo below.)
    """
    ids = ids_ref[...][:, 0]                                   # (tile,)
    out_ref[...] = jnp.take(table_ref[...], ids, axis=0).astype(out_ref.dtype)


def custom_embedding_forward(x, table, padding_class, *,
                             token_tile=512,
                             gather_num_class_threshold=1024):
    """x: (B, S) int indices, table: (num_class, D) -> (B, S, D).

    Note: out-of-range / negative ids produce all-zero rows (one-hot matches
    nothing) rather than raising like PyTorch.  The table dtype is preserved
    (no bf16 downcast) so gathered rows are bit-exact vs. the reference.
    On v5e prefer a lower `gather_num_class_threshold` (~256): the one-hot
    path goes MXU/VALU-bound much earlier there.
    """
    B, S = x.shape
    num_class, D = table.shape
    N = B * S
    itemsize = jnp.dtype(table.dtype).itemsize

    # ---- wrapper-side layout plumbing (pure XLA, one-time) -----------------
    #  (a) zero the padding_class row so the kernel needs no mask,
    #  (b) pad D up to a lane-dense multiple of 128 for unmasked stores.
    d_pad = _round_up(D, 128)
    table_p = table
    if 0 <= int(padding_class) < num_class:
        table_p = table_p.at[int(padding_class)].set(0)
    if d_pad != D:
        table_p = jnp.pad(table_p, ((0, 0), (0, d_pad - D)))
    # TODO(synk): in a real model store the table pre-padded / pre-zeroed so
    # this prep is not redone every forward call.

    # ---- generation-aware VMEM budgeting -----------------------------------
    try:
        vmem_cap = int(pltpu.get_tpu_info().vmem_capacity_bytes)
    except Exception:
        vmem_cap = 64 * 1024 * 1024            # v7x-safe default
    vmem_limit = int(vmem_cap * 0.75)          # ~96 MiB v5e/v6e, ~48 MiB v7x
    vmem_budget = int(vmem_limit * 0.9)

    use_onehot = num_class <= gather_num_class_threshold
    table_bytes = _vmem_tile_bytes(num_class, d_pad, itemsize)   # single-buffered

    def tile_bytes(t):
        b = 2 * _vmem_tile_bytes(t, 1, 4)                # ids tiles (x2 buffers)
        b += 2 * _vmem_tile_bytes(t, d_pad, itemsize)    # out tiles (x2 buffers)
        b += _vmem_tile_bytes(t, d_pad, 4)               # f32 matmul / gather temp
        if use_onehot:
            b += _vmem_tile_bytes(t, num_class, 4)       # one-hot intermediate
        return b

    tile = max(8, min(_round_up(token_tile, 8), _round_up(N, 8)))
    while tile > 8 and table_bytes + tile_bytes(tile) > vmem_budget:
        tile = max(8, _round_up(tile // 2, 8))
    if table_bytes + tile_bytes(tile) > vmem_budget:
        # TODO(synk): scalar-prefetched DMA row-gather path for tables that do
        # not fit resident in VMEM.
        raise NotImplementedError(
            f"embedding table (~{table_bytes} B padded) exceeds the "
            f"~{vmem_budget} B VMEM budget on this generation")

    n_pad = _round_up(N, tile)
    ids = x.reshape(N).astype(jnp.int32)
    if n_pad != N:
        # Pad tail with index 0 (always in range); padded rows are sliced off.
        ids = jnp.concatenate([ids, jnp.zeros((n_pad - N,), jnp.int32)])
    ids = ids.reshape(n_pad, 1)

    kernel = _onehot_kernel if use_onehot else _gather_kernel
    grid = (n_pad // tile,)

    def build(single_buffer_table):
        if single_buffer_table:
            # Single-buffered resident table: constant index map => DMA'd once
            # per core; Buffered(1) avoids doubling table VMEM (matters most
            # on v7x's 64 MiB).
            table_spec = pl.BlockSpec((num_class, d_pad), lambda i: (0, 0),
                                      pipeline_mode=pl.Buffered(1))
        else:
            table_spec = pl.BlockSpec((num_class, d_pad), lambda i: (0, 0))
        return pl.pallas_call(
            kernel,
            out_shape=jax.ShapeDtypeStruct((n_pad, d_pad), table.dtype),
            grid_spec=pltpu.PrefetchScalarGridSpec(
                num_scalar_prefetch=0,
                grid=grid,
                in_specs=[
                    pl.BlockSpec((tile, 1), lambda i: (i, 0)),   # token ids tile
                    table_spec,                                  # resident table
                ],
                out_specs=pl.BlockSpec((tile, d_pad), lambda i: (i, 0)),
            ),
            compiler_params=pltpu.CompilerParams(
                # Token tiles are independent: "parallel" lets v7x shard the
                # grid across both TensorCores (each core auto-DMAs its own
                # resident table copy).  Neutral on single-core v5e/v6e.
                dimension_semantics=("parallel",),
                vmem_limit_bytes=vmem_limit,
            ),
        )

    try:
        out_flat = build(True)(ids, table_p)
    except Exception:
        # TODO(synk): pl.Buffered(1) unsupported on this jax/libtpu build; fall
        # back to the default double-buffered table block (2x table VMEM).
        out_flat = build(False)(ids, table_p)

    return out_flat[:N, :D].reshape(B, S, D)


if __name__ == "__main__":
    # Small, module-consistent shapes.
    padding_class = 3
    num_class = 16
    embedded_dim = 32
    B, S = 2, 8

    key = jax.random.PRNGKey(0)
    k_tab, k_idx = jax.random.split(key)

    # nn.Embedding(num_class, embedded_dim, padding_idx=0): row 0 zero at init.
    table = jax.random.normal(k_tab, (num_class, embedded_dim), dtype=jnp.float32)
    table = table.at[0].set(0.0)

    # Deterministic indices; force some positions to padding_class.
    x = jax.random.randint(k_idx, (B, S), 0, num_class, dtype=jnp.int32)
    x = x.at[0, 0].set(padding_class)
    x = x.at[1, 5].set(padding_class)

    out = custom_embedding_forward(x, table, padding_class)
    out = jax.block_until_ready(out)

    # Pure-JAX reference (gather + padding_class zeroing).
    ref = table[x]
    ref = jnp.where((x == padding_class)[..., None], 0.0, ref)
    assert out.shape == (B, S, embedded_dim)
    assert jnp.allclose(out, ref, atol=1e-6), "mismatch vs reference"

    print("KERNEL_OK")
</pallas_src>

<mosaic_0001>
module attributes {stable_mosaic.version = 11 : i64} {
  func.func @_onehot_kernel(%arg0: i32, %arg1: memref<16x1xi32, #tpu.memory_space<vmem>>, %arg2: memref<16x128xf32, #tpu.memory_space<vmem>>, %arg3: memref<16x128xf32, #tpu.memory_space<vmem>>) attributes {dimension_semantics = [#tpu.dimension_semantics<parallel>], iteration_bounds = array<i64: 1>, scalar_prefetch = 0 : i64, scratch_operands = 0 : i64, tpu.core_type = #tpu.core_type<tc>, window_params = [{transform_indices = @transform_0, window_bounds = array<i64: 16, 1>}, {pipeline_mode = #tpu.pipeline_mode<synchronous>, transform_indices = @transform_1, window_bounds = array<i64: 16, 128>}, {transform_indices = @transform_2, window_bounds = array<i64: 16, 128>}]} {
    %0 = tpu.iota {dimensions = array<i32: 1>} : vector<16x16xi32>
    %c0 = arith.constant 0 : index
    %c0_0 = arith.constant 0 : index
    %1 = vector.load %arg1[%c0, %c0_0] : memref<16x1xi32, #tpu.memory_space<vmem>>, vector<16x1xi32>
    %2 = vector.broadcast %1 : vector<16x1xi32> to vector<16x16xi32>
    %3 = arith.cmpi eq, %2, %0 : vector<16x16xi32>
    %4 = arith.extui %3 : vector<16x16xi1> to vector<16x16xi32>
    %5 = arith.sitofp %4 : vector<16x16xi32> to vector<16x16xf32>
    %c0_1 = arith.constant 0 : index
    %c0_2 = arith.constant 0 : index
    %6 = vector.load %arg2[%c0_1, %c0_2] : memref<16x128xf32, #tpu.memory_space<vmem>>, vector<16x128xf32>
    %cst = arith.constant dense<0.000000e+00> : vector<16x128xf32>
    %7 = tpu.matmul %5, %6, %cst {dimension_numbers = #tpu.dot_dimension_numbers<[1], [0], [0], [1], [0, 0, 1, 1], [], []>} : vector<16x16xf32>, vector<16x128xf32>, vector<16x128xf32> -> vector<16x128xf32>
    %c0_3 = arith.constant 0 : index
    %c0_4 = arith.constant 0 : index
    %8 = vector.load %arg3[%c0_3, %c0_4] : memref<16x128xf32, #tpu.memory_space<vmem>>, vector<16x128xf32>
    tpu.vector_store %arg3[%c0_3, %c0_4], %7 {strides = array<i32>} : memref<16x128xf32, #tpu.memory_space<vmem>>, vector<16x128xf32>,
    return
  }
  func.func @transform_0(%arg0: i32) -> (i32, i32) {
    %c0_i32 = arith.constant 0 : i32
    %c0_i32_0 = arith.constant 0 : i32
    return %arg0, %c0_i32 : i32, i32
  }
  func.func @transform_1(%arg0: i32) -> (i32, i32) {
    %c0_i32 = arith.constant 0 : i32
    %c0_i32_0 = arith.constant 0 : i32
    %c0_i32_1 = arith.constant 0 : i32
    return %c0_i32, %c0_i32_0 : i32, i32
  }
  func.func @transform_2(%arg0: i32) -> (i32, i32) {
    %c0_i32 = arith.constant 0 : i32
    %c0_i32_0 = arith.constant 0 : i32
    return %arg0, %c0_i32 : i32, i32
  }
}

module attributes {stable_mosaic.version = 11 : i64} {
  func.func @_onehot_kernel(%arg0: i32, %arg1: memref<16x1xi32, #tpu.memory_space<vmem>>, %arg2: memref<16x128xf32, #tpu.memory_space<vmem>>, %arg3: memref<16x128xf32, #tpu.memory_space<vmem>>) attributes {dimension_semantics = [#tpu.dimension_semantics<parallel>], iteration_bounds = array<i64: 1>, scalar_prefetch = 0 : i64, scratch_operands = 0 : i64, tpu.core_type = #tpu.core_type<tc>, window_params = [{transform_indices = @transform_0, window_bounds = array<i64: 16, 1>}, {pipeline_mode = #tpu.pipeline_mode<synchronous>, transform_indices = @transform_1, window_bounds = array<i64: 16, 128>}, {transform_indices = @transform_2, window_bounds = array<i64: 16, 128>}]} {
    %0 = tpu.iota {dimensions = array<i32: 1>} : vector<16x16xi32>
    %c0 = arith.constant 0 : index
    %c0_0 = arith.constant 0 : index
    %1 = vector.load %arg1[%c0, %c0_0] : memref<16x1xi32, #tpu.memory_space<vmem>>, vector<16x1xi32>
    %2 = vector.broadcast %1 : vector<16x1xi32> to vector<16x16xi32>
    %3 = arith.cmpi eq, %2, %0 : vector<16x16xi32>
    %4 = arith.extui %3 : vector<16x16xi1> to vector<16x16xi32>
    %5 = arith.sitofp %4 : vector<16x16xi32> to vector<16x16xf32>
    %c0_1 = arith.constant 0 : index
    %c0_2 = arith.constant 0 : index
    %6 = vector.load %arg2[%c0_1, %c0_2] : memref<16x128xf32, #tpu.memory_space<vmem>>, vector<16x128xf32>
    %cst = arith.constant dense<0.000000e+00> : vector<16x128xf32>
    %7 = tpu.matmul %5, %6, %cst {dimension_numbers = #tpu.dot_dimension_numbers<[1], [0], [0], [1], [0, 0, 1, 1], [], []>} : vector<16x16xf32>, vector<16x128xf32>, vector<16x128xf32> -> vector<16x128xf32>
    %c0_3 = arith.constant 0 : index
    %c0_4 = arith.constant 0 : index
    %8 = vector.load %arg3[%c0_3, %c0_4] : memref<16x128xf32, #tpu.memory_space<vmem>>, vector<16x128xf32>
    tpu.vector_store %arg3[%c0_3, %c0_4], %7 {strides = array<i32>} : memref<16x128xf32, #tpu.memory_space<vmem>>, vector<16x128xf32>,
    return
  }
  func.func @transform_0(%arg0: i32) -> (i32, i32) {
    %c0_i32 = arith.constant 0 : i32
    %c0_i32_0 = arith.constant 0 : i32
    return %arg0, %c0_i32 : i32, i32
  }
  func.func @transform_1(%arg0: i32) -> (i32, i32) {
    %c0_i32 = arith.constant 0 : i32
    %c0_i32_0 = arith.constant 0 : i32
    %c0_i32_1 = arith.constant 0 : i32
    return %c0_i32, %c0_i32_0 : i32, i32
  }
  func.func @transform_2(%arg0: i32) -> (i32, i32) {
    %c0_i32 = arith.constant 0 : i32
    %c0_i32_0 = arith.constant 0 : i32
    return %arg0, %c0_i32 : i32, i32
  }
}

</mosaic_0001>

<bundles_post_ra>
// kernel: tpu_custom_call.1
= control target key start
LH: loop header
LB: loop body
LE: loop exit
PB: predicated region body
PF: predicated region fallthrough
CT: control target
= control target key end

     0   :  { %v118_v2 = vmov 0   ;;  %s153_s0 = inlined_call_operand.vmem [shape: s32[16,1], index: 0, kind: input, shape index: {}]   ;;  %s154_s1 = inlined_call_operand.vmem [shape: f32[16,128], index: 1, kind: input, shape index: {}]   ;;  %s155_s2 = inlined_call_operand.hbm [shape: f32[16,128], index: 2, kind: output, shape index: {}]  }
   0x1   :  { %v14_v0 = vld [vmem:[%s153_s0] sm:$0xff]  ;;  %v29_v1 = vld [vmem:[%s154_s1 + $0x8] sm:$0xff]  ;;  %91 = vset.pattern.permute.xlu0 %v118_v2 }
   0x2   :  { %51 = vmatpush.msra.mxu0 %v29_v1 }
   0x3   :  { %7 = vsyncpa [#allocation3], 0  ;;  %17 = vperm.xlu0 %91, %v14_v0   ;;  %84 = vmatpush.msra.mxu1 %v29_v1  ;;  %v15_v3 = vld [vmem:[%s153_s0 + $0x8] sm:$0xff]  ;;  %v28_v4 = vld [vmem:[%s154_s1] sm:$0xff]  ;;  %v12_v5 = vlaneseq  ;;  %vm30_vm0 = vcmask 130048   ;;  %v119_v8 = vmov 0.0  }
   0x4   :  { %52 = vmatpush.msra.mxu0 %v28_v4  ;;  %s120_s0 = smov [#allocation2]   ;;  %s68_s19 = sshll.u32 %s155_s2, 4  ;;  %s69_s19 = int_to_ptr.hbm [resolvable:$true] %s68_s19 }
   0x5   :  { %85 = vmatpush.msra.mxu1 %v28_v4  ;;  %v13_v6 = vand.u32 127, %v12_v5  ;;  %s66_s17 = sshll.u32 %s120_s0, 4  ;;  %s121_s20 = smov 128   ;;  %s67_s17 = int_to_ptr.vmem [resolvable:$true] %s66_s17 }
   0x6   :  { %s122_s21 = smov 8  }
   0xb   :  { %20 = vperm.xlu0 %91, %v15_v3  }
  0x75   :  { %v18_v7 = vpop.permute.xlu0 %17 }
  0x76   :  { %vm22_vm1 = vcmp.eq.s32.totalorder %v18_v7, %v13_v6 }
  0x77   :  { %v80_v9 = vsel %vm22_vm1, 1.0, %v119_v8 }
  0x78   :  { %82 = vmatmul.msk.f32.vlgmr.msra.gmra.mxu0 %vm30_vm0, %v80_v9 }
  0x7d   :  { %v21_v10 = vpop.permute.xlu0 %20 }
  0x7e   :  { %vm23_vm2 = vcmp.eq.s32.totalorder %v21_v10, %v13_v6 }
  0x7f   :  { %v81_v11 = vsel %vm23_vm2, 1.0, %v119_v8 }
  0x80   :  { %83 = vmatmul.msk.f32.vlgmr.msra.gmra.mxu1 %vm30_vm0, %v81_v11 }
  0xf5   :  { %v54_v12 = vpop.f32.mrf.mxu0 }
  0xf6   :  { %60 = vst [vmem:[#allocation2] sm:$0xff] %v54_v12 }
  0xfd   :  { %v57_v13 = vpop.f32.mrf.mxu1 }
  0xfe   :  { %61 = vst [vmem:[#allocation2 + $0x8] sm:$0xff] %v57_v13 }
  0xff   :  { %74 = dma.vmem_to_hbm [thread:$0]  %s67_s17, 256, %s69_s19, [#allocation3], %s121_s20, %s121_s20, %s122_s21  }
 0x100   :  { %116 = dma.done.wait [#allocation3], 256  }
 0x101   :  { %117 = vsyncadd [#allocation3], 4294967040 }
 0x102   :  { %79 = vsyncpa [#allocation3], 1 }

// kernel: tpu_custom_call.1
= control target key start
LH: loop header
LB: loop body
LE: loop exit
PB: predicated region body
PF: predicated region fallthrough
CT: control target
= control target key end

     0   :  { %v118_v2 = vmov 0   ;;  %s153_s0 = inlined_call_operand.vmem [shape: s32[16,1], index: 0, kind: input, shape index: {}]   ;;  %s154_s1 = inlined_call_operand.vmem [shape: f32[16,128], index: 1, kind: input, shape index: {}]   ;;  %s155_s2 = inlined_call_operand.hbm [shape: f32[16,128], index: 2, kind: output, shape index: {}]  }
   0x1   :  { %v14_v0 = vld [vmem:[%s153_s0] sm:$0xff]  ;;  %v29_v1 = vld [vmem:[%s154_s1 + $0x8] sm:$0xff]  ;;  %91 = vset.pattern.permute.xlu0 %v118_v2 }
   0x2   :  { %51 = vmatpush.msra.mxu0 %v29_v1 }
   0x3   :  { %7 = vsyncpa [#allocation3], 0  ;;  %17 = vperm.xlu0 %91, %v14_v0   ;;  %84 = vmatpush.msra.mxu1 %v29_v1  ;;  %v15_v3 = vld [vmem:[%s153_s0 + $0x8] sm:$0xff]  ;;  %v28_v4 = vld [vmem:[%s154_s1] sm:$0xff]  ;;  %v12_v5 = vlaneseq  ;;  %vm30_vm0 = vcmask 130048   ;;  %v119_v8 = vmov 0.0  }
   0x4   :  { %52 = vmatpush.msra.mxu0 %v28_v4  ;;  %s120_s0 = smov [#allocation2]   ;;  %s68_s19 = sshll.u32 %s155_s2, 4  ;;  %s69_s19 = int_to_ptr.hbm [resolvable:$true] %s68_s19 }
   0x5   :  { %85 = vmatpush.msra.mxu1 %v28_v4  ;;  %v13_v6 = vand.u32 127, %v12_v5  ;;  %s66_s17 = sshll.u32 %s120_s0, 4  ;;  %s121_s20 = smov 128   ;;  %s67_s17 = int_to_ptr.vmem [resolvable:$true] %s66_s17 }
   0x6   :  { %s122_s21 = smov 8  }
   0xb   :  { %20 = vperm.xlu0 %91, %v15_v3  }
  0x75   :  { %v18_v7 = vpop.permute.xlu0 %17 }
  0x76   :  { %vm22_vm1 = vcmp.eq.s32.totalorder %v18_v7, %v13_v6 }
  0x77   :  { %v80_v9 = vsel %vm22_vm1, 1.0, %v119_v8 }
  0x78   :  { %82 = vmatmul.msk.f32.vlgmr.msra.gmra.mxu0 %vm30_vm0, %v80_v9 }
  0x7d   :  { %v21_v10 = vpop.permute.xlu0 %20 }
  0x7e   :  { %vm23_vm2 = vcmp.eq.s32.totalorder %v21_v10, %v13_v6 }
  0x7f   :  { %v81_v11 = vsel %vm23_vm2, 1.0, %v119_v8 }
  0x80   :  { %83 = vmatmul.msk.f32.vlgmr.msra.gmra.mxu1 %vm30_vm0, %v81_v11 }
  0xf5   :  { %v54_v12 = vpop.f32.mrf.mxu0 }
  0xf6   :  { %60 = vst [vmem:[#allocation2] sm:$0xff] %v54_v12 }
  0xfd   :  { %v57_v13 = vpop.f32.mrf.mxu1 }
  0xfe   :  { %61 = vst [vmem:[#allocation2 + $0x8] sm:$0xff] %v57_v13 }
  0xff   :  { %74 = dma.vmem_to_hbm [thread:$0]  %s67_s17, 256, %s69_s19, [#allocation3], %s121_s20, %s121_s20, %s122_s21  }
 0x100   :  { %116 = dma.done.wait [#allocation3], 256  }
 0x101   :  { %117 = vsyncadd [#allocation3], 4294967040 }
 0x102   :  { %79 = vsyncpa [#allocation3], 1 }

</bundles_post_ra>
